<compile_context>
chip_gen: v5e
topology: v5e:2x2
jax: 0.10.0
libtpu: 0.0.40
codegen_flags: <defaults>
</compile_context>

<pallas_src>
import functools

import jax
import jax.numpy as jnp
from jax import lax
from jax.experimental import pallas as pl
from jax.experimental.pallas import tpu as pltpu


def _round_up(v, m):
    return (v + m - 1) // m * m


def _layernorm_kernel(x_ref, w_ref, b_ref, o_ref, *, eps, dmodel, d_pad):
    x = x_ref[...]
    if x.dtype != jnp.float32:
        x = x.astype(jnp.float32)            # accumulate statistics in f32

    # Padded feature lanes hold zeros, so they contribute nothing to the sum;
    # the mean can therefore divide by the true dmodel directly.
    mu = jnp.sum(x, axis=-1, keepdims=True) * (1.0 / dmodel)
    diff = x - mu

    sq = diff * diff
    if d_pad != dmodel:
        # Padded lanes have diff == -mu, so mask them out of the variance.
        lane = lax.broadcasted_iota(jnp.int32, x.shape, dimension=1)
        sq = jnp.where(lane < dmodel, sq, 0.0)

    # torch.std uses the unbiased estimator (divide by N-1) by default.
    var = jnp.sum(sq, axis=-1, keepdims=True) * (1.0 / (dmodel - 1))
    sigma = jnp.sqrt(var)

    # Reciprocal + multiply instead of a VALU divide.  approx=True would push
    # it fully onto the EUP, but the kernel is memory-bound and full precision
    # keeps the numerics tight, so approx=False here.
    inv = pl.reciprocal(sigma + eps, approx=False)

    b = b_ref[...].astype(jnp.float32)       # (1, d_pad)  multiplicative (PyTorch self.bias)
    w = w_ref[...].astype(jnp.float32)       # (1, d_pad)  additive       (PyTorch self.w)
    out = diff * inv * b + w
    o_ref[...] = out.astype(o_ref.dtype)


def layernorm(x, w, bias, eps=1e-5, block_rows=None,
              vmem_limit_bytes=56 * 1024 * 1024):
    """Pallas TPU LayerNorm matching the PyTorch module's forward pass.

    x: (N, dmodel); w (additive, zeros-init), bias (multiplicative, ones-init): (dmodel,).
    Semantics: (x - mean) / (unbiased_std + eps) * bias + w
    """
    n, dmodel = x.shape
    assert dmodel >= 2, "unbiased std requires dmodel >= 2"
    itemsize = jnp.dtype(x.dtype).itemsize

    # Lane-dense feature axis: pad to a multiple of 128 so stores are full-lane.
    d_pad = _round_up(dmodel, 128)

    if block_rows is None:
        # x + out tiles are each double-buffered => 4 resident tiles.  Keep
        # them under ~36 MiB so tiles + f32 temporaries fit comfortably inside
        # v7x's 64 MiB physical VMEM (and well inside v5e/v6e's 128 MiB).
        tile_budget = 36 * 1024 * 1024
        max_rows = max(8, tile_budget // (4 * d_pad * itemsize))
        block_rows = int(min(512, max_rows, _round_up(n, 8)))
        block_rows = max(8, (block_rows // 8) * 8)

    n_pad = _round_up(n, block_rows)

    xp = x
    if n_pad != n or d_pad != dmodel:
        xp = jnp.pad(x, ((0, n_pad - n), (0, d_pad - dmodel)))
    w2 = jnp.pad(w, (0, d_pad - dmodel)).reshape(1, d_pad)
    b2 = jnp.pad(bias, (0, d_pad - dmodel)).reshape(1, d_pad)

    kernel = functools.partial(_layernorm_kernel, eps=eps, dmodel=dmodel,
                               d_pad=d_pad)

    out = pl.pallas_call(
        kernel,
        out_shape=jax.ShapeDtypeStruct((n_pad, d_pad), x.dtype),
        grid_spec=pltpu.PrefetchScalarGridSpec(
            num_scalar_prefetch=0,
            grid=(n_pad // block_rows,),
            in_specs=[
                pl.BlockSpec((block_rows, d_pad), lambda i: (i, 0)),
                pl.BlockSpec((1, d_pad), lambda i: (0, 0)),
                pl.BlockSpec((1, d_pad), lambda i: (0, 0)),
            ],
            out_specs=pl.BlockSpec((block_rows, d_pad), lambda i: (i, 0)),
        ),
        compiler_params=pltpu.CompilerParams(
            dimension_semantics=("parallel",),
            vmem_limit_bytes=vmem_limit_bytes,
        ),
    )(xp, w2, b2)

    if n_pad != n or d_pad != dmodel:
        out = out[:n, :dmodel]
    return out


if __name__ == "__main__":
    key = jax.random.PRNGKey(0)
    n, dmodel = 8, 4
    x = jax.random.normal(key, (n, dmodel), dtype=jnp.float32)

    # Deterministic params, exactly as in the module's __init__:
    # self.w = zeros(dmodel) (additive), self.bias = ones(dmodel) (multiplier)
    w = jnp.zeros((dmodel,), dtype=jnp.float32)
    bias = jnp.ones((dmodel,), dtype=jnp.float32)
    eps = 1e-5

    out = layernorm(x, w, bias, eps=eps)
    out = jax.block_until_ready(out)

    # Pure-JAX reference (torch.std is unbiased -> ddof=1)
    mu = jnp.mean(x, axis=-1, keepdims=True)
    sigma = jnp.std(x, axis=-1, keepdims=True, ddof=1)
    ref = (x - mu) / (sigma + eps) * bias + w

    assert out.shape == (n, dmodel)
    assert jnp.allclose(out, ref, atol=1e-5, rtol=1e-5), "mismatch vs reference"
    print("KERNEL_OK")
</pallas_src>

<mosaic_0001>
module attributes {stable_mosaic.version = 11 : i64} {
  func.func @_layernorm_kernel(%arg0: i32, %arg1: memref<8x128xf32, #tpu.memory_space<vmem>>, %arg2: memref<1x128xf32, #tpu.memory_space<vmem>>, %arg3: memref<1x128xf32, #tpu.memory_space<vmem>>, %arg4: memref<8x128xf32, #tpu.memory_space<vmem>>) attributes {dimension_semantics = [#tpu.dimension_semantics<parallel>], iteration_bounds = array<i64: 1>, scalar_prefetch = 0 : i64, scratch_operands = 0 : i64, tpu.core_type = #tpu.core_type<tc>, window_params = [{transform_indices = @transform_0, window_bounds = array<i64: 8, 128>}, {pipeline_mode = #tpu.pipeline_mode<synchronous>, transform_indices = @transform_1, window_bounds = array<i64: 1, 128>}, {pipeline_mode = #tpu.pipeline_mode<synchronous>, transform_indices = @transform_2, window_bounds = array<i64: 1, 128>}, {transform_indices = @transform_3, window_bounds = array<i64: 8, 128>}]} {
    %c0 = arith.constant 0 : index
    %c0_0 = arith.constant 0 : index
    %0 = vector.load %arg1[%c0, %c0_0] : memref<8x128xf32, #tpu.memory_space<vmem>>, vector<8x128xf32>
    %cst = arith.constant dense<0.000000e+00> : vector<8xf32>
    %1 = vector.multi_reduction <add>, %0, %cst [1] : vector<8x128xf32> to vector<8xf32>
    %2 = vector.shape_cast %1 : vector<8xf32> to vector<8x1xf32>
    %cst_1 = arith.constant 2.500000e-01 : f32
    %3 = vector.broadcast %cst_1 : f32 to vector<8x1xf32>
    %4 = arith.mulf %2, %3 : vector<8x1xf32>
    %5 = vector.broadcast %4 : vector<8x1xf32> to vector<8x128xf32>
    %6 = arith.subf %0, %5 : vector<8x128xf32>
    %7 = arith.mulf %6, %6 : vector<8x128xf32>
    %8 = tpu.iota {dimensions = array<i32: 1>} : vector<8x128xi32>
    %c4_i32 = arith.constant 4 : i32
    %9 = vector.broadcast %c4_i32 : i32 to vector<8x128xi32>
    %10 = arith.cmpi slt, %8, %9 : vector<8x128xi32>
    %cst_2 = arith.constant 0.000000e+00 : f32
    %11 = vector.broadcast %cst_2 : f32 to vector<8x128xf32>
    %12 = arith.select %10, %7, %11 : vector<8x128xi1>, vector<8x128xf32>
    %cst_3 = arith.constant dense<0.000000e+00> : vector<8xf32>
    %13 = vector.multi_reduction <add>, %12, %cst_3 [1] : vector<8x128xf32> to vector<8xf32>
    %14 = vector.shape_cast %13 : vector<8xf32> to vector<8x1xf32>
    %cst_4 = arith.constant 0.333333343 : f32
    %15 = vector.broadcast %cst_4 : f32 to vector<8x1xf32>
    %16 = arith.mulf %14, %15 : vector<8x1xf32>
    %17 = math.sqrt %16 : vector<8x1xf32>
    %cst_5 = arith.constant 9.99999974E-6 : f32
    %18 = vector.broadcast %cst_5 : f32 to vector<8x1xf32>
    %19 = arith.addf %17, %18 : vector<8x1xf32>
    %20 = tpu.reciprocal %19 : vector<8x1xf32> -> vector<8x1xf32>
    %c0_6 = arith.constant 0 : index
    %c0_7 = arith.constant 0 : index
    %21 = vector.load %arg3[%c0_6, %c0_7] : memref<1x128xf32, #tpu.memory_space<vmem>>, vector<1x128xf32>
    %c0_8 = arith.constant 0 : index
    %c0_9 = arith.constant 0 : index
    %22 = vector.load %arg2[%c0_8, %c0_9] : memref<1x128xf32, #tpu.memory_space<vmem>>, vector<1x128xf32>
    %23 = vector.broadcast %20 : vector<8x1xf32> to vector<8x128xf32>
    %24 = arith.mulf %6, %23 : vector<8x128xf32>
    %25 = vector.broadcast %21 : vector<1x128xf32> to vector<8x128xf32>
    %26 = arith.mulf %24, %25 : vector<8x128xf32>
    %27 = vector.broadcast %22 : vector<1x128xf32> to vector<8x128xf32>
    %28 = arith.addf %26, %27 : vector<8x128xf32>
    %c0_10 = arith.constant 0 : index
    %c0_11 = arith.constant 0 : index
    %29 = vector.load %arg4[%c0_10, %c0_11] : memref<8x128xf32, #tpu.memory_space<vmem>>, vector<8x128xf32>
    tpu.vector_store %arg4[%c0_10, %c0_11], %28 {strides = array<i32>} : memref<8x128xf32, #tpu.memory_space<vmem>>, vector<8x128xf32>,
    return
  }
  func.func @transform_0(%arg0: i32) -> (i32, i32) {
    %c0_i32 = arith.constant 0 : i32
    %c0_i32_0 = arith.constant 0 : i32
    return %arg0, %c0_i32 : i32, i32
  }
  func.func @transform_1(%arg0: i32) -> (i32, i32) {
    %c0_i32 = arith.constant 0 : i32
    %c0_i32_0 = arith.constant 0 : i32
    %c0_i32_1 = arith.constant 0 : i32
    return %c0_i32, %c0_i32_0 : i32, i32
  }
  func.func @transform_2(%arg0: i32) -> (i32, i32) {
    %c0_i32 = arith.constant 0 : i32
    %c0_i32_0 = arith.constant 0 : i32
    %c0_i32_1 = arith.constant 0 : i32
    return %c0_i32, %c0_i32_0 : i32, i32
  }
  func.func @transform_3(%arg0: i32) -> (i32, i32) {
    %c0_i32 = arith.constant 0 : i32
    %c0_i32_0 = arith.constant 0 : i32
    return %arg0, %c0_i32 : i32, i32
  }
}

</mosaic_0001>

<bundles_post_ra>
// kernel: tpu_custom_call.1
= control target key start
LH: loop header
LB: loop body
LE: loop exit
PB: predicated region body
PF: predicated region fallthrough
CT: control target
= control target key end

     0   :  { %8 = vsyncpa [#allocation3], 0  ;;  %s235_s0 = inlined_call_operand.hbm [shape: f32[8,128], index: 0, kind: input, shape index: {}]   ;;  %s236_s1 = inlined_call_operand.hbm [shape: f32[1,128], index: 1, kind: input, shape index: {}]   ;;  %s237_s2 = inlined_call_operand.vmem [shape: f32[1,128], index: 2, kind: input, shape index: {}]   ;;  %s238_s3 = inlined_call_operand.hbm [shape: f32[8,128], index: 3, kind: output, shape index: {}]  }
   0x1   :  { %9 = vsyncpa [#allocation6], 0 }
   0x2   :  { %10 = vsyncpa [#allocation4], 0  ;;  %s16_s14 = sshll.u32 %s235_s0, 4  ;;  %s200_s15 = smov [#allocation2]   ;;  %s17_s14 = int_to_ptr.hbm [resolvable:$true] %s16_s14 }
   0x3   :  { %s18_s16 = sshll.u32 %s200_s15, 4  ;;  %s27_s19 = sshll.u32 %s236_s1, 4  ;;  %s19_s16 = int_to_ptr.vmem [resolvable:$true] %s18_s16  ;;  %s28_s19 = int_to_ptr.hbm [resolvable:$true] %s27_s19 }
   0x4   :  { %21 = dma.hbm_to_vmem [thread:$0]  %s17_s14, 128, %s19_s16, [#allocation3]  }
   0x5   :  { %s201_s20 = smov [#allocation5]  }
   0x6   :  { %s29_s21 = sshll.u32 %s201_s20, 4  ;;  %s30_s21 = int_to_ptr.vmem [resolvable:$true] %s29_s21 }
   0x7   :  { %32 = dma.hbm_to_vmem [thread:$0]  %s28_s19, 16, %s30_s21, [#allocation6]  }
   0x8   :  { %194 = dma.done.wait [#allocation3], 128  }
   0x9   :  { %195 = vsyncadd [#allocation3], 4294967168 }
   0xa   :  { %196 = dma.done.wait [#allocation6], 16  }
   0xb   :  { %197 = vsyncadd [#allocation6], 4294967280  ;;  %v43_v0 = vld [vmem:[#allocation2] sm:$0xff]  ;;  %v49_v1 = vlaneseq  ;;  %v117_v33 = vld [vmem:[#allocation5] ss:$0 sm:$0xff]  ;;  %s202_s22 = smov [#allocation7]  }
   0xc   :  { %44 = vadd.xlane.f32.xlu0 %v43_v0  ;;  %v116_v30 = vld [vmem:[%s237_s2] ss:$0 sm:$0xff]  ;;  %s100_s23 = sshll.u32 %s202_s22, 4  ;;  %s102_s26 = sshll.u32 %s238_s3, 4  ;;  %s101_s23 = int_to_ptr.vmem [resolvable:$true] %s100_s23  ;;  %s103_s26 = int_to_ptr.hbm [resolvable:$true] %s102_s26 }
   0xd   :  { %v50_v3 = vand.u32 127, %v49_v1 }
   0xf   :  { %vm51_vm0 = vcmp.lt.s32.totalorder %v50_v3, 4 }
  0x7f   :  { %v45_v2 = vpop.xlane.xlu0 %44 }
  0x80   :  { %v46_v4 = vmul.f32 0.25, %v45_v2 }
  0x82   :  { %v47_v5 = vsub.f32 %v43_v0, %v46_v4 }
  0x84   :  { %v48_v6 = vmul.f32 %v47_v5, %v47_v5 }
  0x86   :  { %v52_v7 = vsel %vm51_vm0, %v48_v6, 0.0 }
  0x87   :  { %53 = vadd.xlane.f32.xlu0 %v52_v7 }
  0xfa   :  { %v54_v8 = vpop.xlane.xlu0 %53 }
  0xfb   :  { %v55_v9 = vmul.f32 0.33333334, %v54_v8 }
  0xfd   :  { %118 = vrsqrt.f32 %v55_v9  ;;  %vm63_vm1 = vcmp.eq.f32.partialorder %v55_v9, inf  ;;  %v66_v17 = vand.u32 2147483648, %v55_v9  ;;  %vm65_vm2 = vcmp.eq.f32.partialorder %v55_v9, 0.0 }
 0x103   :  { %v119_v10 = vpop.eup %118 }
 0x104   :  { %v57_v11 = vmul.f32 %v119_v10, %v55_v9 }
 0x106   :  { %v58_v12 = vmul.f32 %v119_v10, %v57_v11 }
 0x108   :  { %v59_v13 = vmul.f32 0.5, %v58_v12 }
 0x10a   :  { %v60_v14 = vsub.f32 1.5, %v59_v13 }
 0x10c   :  { %v61_v15 = vmul.f32 %v119_v10, %v60_v14 }
 0x10e   :  { %v62_v16 = vmul.f32 %v61_v15, %v55_v9 }
 0x110   :  { %v64_v18 = vsel %vm63_vm1, %v55_v9, %v62_v16 }
 0x111   :  { %v67_v19 = vsel %vm65_vm2, %v66_v17, %v64_v18 }
 0x112   :  { %v68_v20 = vadd.f32 1e-05, %v67_v19 }
 0x114   :  { %120 = vrcp.f32 %v68_v20  ;;  %v80_v24 = vand.u32 2147483648, %v68_v20  ;;  %v78_v26 = vand.u32 2147483647, %v68_v20  ;;  %vm74_vm4 = vweird.f32 %v68_v20 }
 0x116   :  { %v81_v28 = vor.u32 1.1754944e-38, %v80_v24  ;;  %vm79_vm6 = vcmp.eq.f32.partialorder %v78_v26, 8.507059e+37 }
 0x11a   :  { %v121_v21 = vpop.eup %120 }
 0x11b   :  { %v70_v22 = vmul.f32 %v121_v21, %v68_v20  ;;  %vm75_vm3 = vweird.f32 %v121_v21 }
 0x11c   :  { %vm76_vm5 = vmor %vm74_vm4, %vm75_vm3 }
 0x11d   :  { %v71_v23 = vsub.f32 1.0, %v70_v22 }
 0x11f   :  { %v72_v25 = vmul.f32 %v121_v21, %v71_v23 }
 0x121   :  { %v73_v27 = vadd.f32 %v121_v21, %v72_v25 }
 0x123   :  { %v77_v29 = vsel %vm76_vm5, %v121_v21, %v73_v27 }
 0x124   :  { %v82_v31 = vsel %vm79_vm6, %v81_v28, %v77_v29 }
 0x125   :  { %v85_v32 = vmul.f32 %v82_v31, %v47_v5 }
 0x127   :  { %v89_v34 = vmul.f32 %v116_v30, %v85_v32 }
 0x129   :  { %v93_v35 = vadd.f32 %v117_v33, %v89_v34 }
 0x12b   :  { %94 = vst [vmem:[#allocation7] sm:$0xff] %v93_v35 }
 0x12c   :  { %105 = dma.vmem_to_hbm [thread:$0]  %s101_s23, 128, %s103_s26, [#allocation4]  }
 0x12d   :  { %198 = dma.done.wait [#allocation4], 128  }
 0x12e   :  { %199 = vsyncadd [#allocation4], 4294967168 }
 0x12f   :  { %110 = vsyncpa [#allocation3], 1 }
 0x130   :  { %111 = vsyncpa [#allocation6], 1 }
 0x131   :  { %112 = vsyncpa [#allocation4], 1 }

</bundles_post_ra>
